<compile_context>
chip_gen: v5e
topology: v5e:2x2
jax: 0.10.0
libtpu: 0.0.40
codegen_flags: <defaults>
</compile_context>

<pallas_src>
import functools
import numpy as np
import jax
import jax.numpy as jnp
from jax.experimental import pallas as pl
from jax.experimental.pallas import tpu as pltpu

_PART_ROWS = 16  # sublane rows of each per-block partial-sum tile (>= max n_acc=12, mult. of 8)


# ----------------------------------------------------------------------------
# Constraint-matrix construction (mirrors the PyTorch __init__ loops exactly,
# including the y_1-passed-twice quirk of the original code).
# ----------------------------------------------------------------------------
def _element_M(a0, a1, y0, y1, s):
    if a0 is None or a1 is None:
        x = (y0 == y1)
        return -1.0 * s * float(x)
    else:
        x = (a0 == a1) and (y0 == y1)
        return s * float(x)


def build_constraints(fairness, bound, num_classes=2):
    eps = bound
    sensitive_classes = [0, 1]
    y_classes = [0, 1]
    if fairness == "dp":
        n_constraints = 2 * num_classes
        dim_condition = num_classes + 1
        M = np.zeros((n_constraints, dim_condition), dtype=np.float32)
        c = np.array([eps] * n_constraints, dtype=np.float32)
        for i in range(n_constraints):
            j = i % 2
            if i == 0 or i == 1:
                if j == 0:
                    M[i, j] = 1.0
                    M[i, -1] = -1.0
                else:
                    M[i, j - 1] = -1.0
                    M[i, -1] = 1.0
            elif i == 2 or i == 3:
                if j == 0:
                    M[i, j + 1] = 1.0
                    M[i, -1] = -1.0
                else:
                    M[i, j] = -1.0
                    M[i, -1] = 1.0
        return M, c
    elif fairness == "eo":
        n_constraints = num_classes * num_classes * 2
        dim_condition = num_classes * (num_classes + 1)
        M = np.zeros((n_constraints, dim_condition), dtype=np.float32)
        c = np.zeros(n_constraints, dtype=np.float32)
        element_k_a = sensitive_classes + [None]
        for i_a, a_0 in enumerate(sensitive_classes):
            for i_y, y_0 in enumerate(y_classes):
                for i_s, s in enumerate([-1, 1]):
                    for j_y, y_1 in enumerate(y_classes):
                        for j_a, a_1 in enumerate(element_k_a):
                            i = i_a * (2 * num_classes) + i_y * 2 + i_s
                            j = j_y + num_classes * j_a
                            M[i, j] = _element_M(a_0, a_1, y_1, y_1, s)
        return M, c
    else:  # 'none'
        return None, None


# ----------------------------------------------------------------------------
# Pallas kernels
# ----------------------------------------------------------------------------
def _lr_fair_kernel(x_ref, w_ref, b_ref, sy_ref, pred_ref, part_ref, *,
                    fairness, n_valid, block_n):
    i = pl.program_id(0)

    # Lane-dense logits for this tile: contract the feature (lane) axis of both operands.
    # w_ref row 0 holds the real weights, rows 1..7 are zero padding so the MXU sees M=8.
    z8 = jax.lax.dot_general(
        w_ref[...], x_ref[...],
        dimension_numbers=(((1,), (1,)), ((), ())),
        preferred_element_type=jnp.float32)                   # (8, block_n)
    p = jax.nn.sigmoid(z8[0:1, :] + b_ref[0, 0])              # (1, block_n), lane-dense
    pred_ref[...] = p

    # Mask out rows padded past the true batch size (only affects the last tile).
    lane = jax.lax.broadcasted_iota(jnp.int32, (1, block_n), 1)
    valid = ((i * block_n + lane) < n_valid).astype(jnp.float32)

    s = sy_ref[0:1, :]
    y = sy_ref[1:2, :]
    if fairness == "dp":
        m_s0 = jnp.where(s == 0.0, 1.0, 0.0) * valid
        m_s1 = jnp.where(s == 1.0, 1.0, 0.0) * valid
        # mu = [E[p|s=0], E[p|s=1], E[p]]  (numerator, denominator) pairs, in mu order.
        rows = [p * m_s0, m_s0, p * m_s1, m_s1, p * valid, valid]
    else:  # 'eo'
        m_s0 = jnp.where(s == 0.0, 1.0, 0.0) * valid
        m_s1 = jnp.where(s == 1.0, 1.0, 0.0) * valid
        m_y0 = jnp.where(y == 0.0, 1.0, 0.0) * valid
        m_y1 = jnp.where(y == 1.0, 1.0, 0.0) * valid
        w00, w01 = m_s0 * m_y0, m_s0 * m_y1
        w10, w11 = m_s1 * m_y0, m_s1 * m_y1
        # mu order: (s=0,y=0),(s=0,y=1),(s=1,y=0),(s=1,y=1), then y=0, y=1 marginals.
        rows = [p * w00, w00, p * w01, w01, p * w10, w10, p * w11, w11,
                p * m_y0, m_y0, p * m_y1, m_y1]

    n_acc = len(rows)
    sums = jnp.concatenate(
        [jnp.sum(r, axis=1, keepdims=True) for r in rows], axis=0)   # (n_acc, 1)

    # Per-block partial sums, written into this block's own (16,128) output tile.
    part_ref[...] = jnp.zeros((_PART_ROWS, 128), jnp.float32)
    part_ref[0:n_acc, 0:1] = sums


def _lr_plain_kernel(x_ref, w_ref, b_ref, pred_ref):
    z8 = jax.lax.dot_general(
        w_ref[...], x_ref[...],
        dimension_numbers=(((1,), (1,)), ((), ())),
        preferred_element_type=jnp.float32)
    pred_ref[...] = jax.nn.sigmoid(z8[0:1, :] + b_ref[0, 0])


# ----------------------------------------------------------------------------
# Tiling / VMEM sizing helpers
# ----------------------------------------------------------------------------
def _round_up(v, m):
    return ((v + m - 1) // m) * m


def _vmem_capacity_bytes():
    try:
        return int(pltpu.get_tpu_info().vmem_capacity_bytes)
    except Exception:
        return 64 * 1024 * 1024     # conservative fallback: v7x per-TensorCore VMEM


def _choose_block_n(n, d, itemsize, vmem_cap):
    """Pick a batch tile that moves >= ~4 MiB of HBM per step but keeps the
    lane-padded, double-buffered x tiles well inside VMEM on every generation."""
    padded_d = _round_up(max(d, 1), 128)                   # (block_n, D) tile is lane-padded
    per_buf = min(24 * 1024 * 1024, vmem_cap // 4)         # each of the 2 x buffers
    cap_rows = max(128, (per_buf // (padded_d * itemsize)) // 128 * 128)
    want_rows = _round_up((4 * 1024 * 1024 + d * itemsize - 1) // max(1, d * itemsize), 128)
    target = max(128, min(cap_rows, want_rows))
    n128 = _round_up(n, 128)
    if n128 <= target:
        return n128
    nblk = (n128 + target - 1) // target                   # balance blocks -> minimal tail pad
    return _round_up((n128 + nblk - 1) // nblk, 128)


def _vmem_limit_bytes(block_n, d, itemsize, vmem_cap):
    padded_d = _round_up(max(d, 1), 128)
    need = (2 * block_n * padded_d * itemsize      # x double buffers (lane-padded)
            + 2 * 8 * block_n * 4                  # s/y block (2 rows -> 8 sublanes), x2 buffers
            + 2 * 8 * block_n * 4                  # pred block (1 row -> 8 sublanes), x2 buffers
            + 2 * _PART_ROWS * 128 * 4             # partial-sum tiles, x2 buffers
            + 8 * padded_d * itemsize              # resident weight
            + 64 * block_n * 4                     # elementwise temporaries (logits/masks/stats)
            + 2 * 1024 * 1024)                     # headroom
    return int(min(int(0.9 * vmem_cap), max(need, 16 * 1024 * 1024)))


# ----------------------------------------------------------------------------
# Wrapper (forward pass)
# ----------------------------------------------------------------------------
def lr_forward(x, w, b, s, y, M, c, fairness, *, block_n=None):
    N, D = x.shape
    itemsize = jnp.dtype(x.dtype).itemsize
    vmem_cap = _vmem_capacity_bytes()
    if block_n is None:
        block_n = _choose_block_n(N, D, itemsize, vmem_cap)
    block_n = max(128, (int(block_n) // 128) * 128)
    n_pad = _round_up(N, block_n)
    nblk = n_pad // block_n

    x_p = x if n_pad == N else jnp.pad(x, ((0, n_pad - N), (0, 0)))
    # Weight as a lane-dense (8, D) block (row 0 = real weights, rest zero), VMEM-resident.
    w_row = jnp.zeros((8, D), jnp.float32).at[0, :].set(
        jnp.asarray(w, jnp.float32).reshape(D)).astype(x.dtype)
    b_sm = jnp.asarray(b, jnp.float32).reshape(1, 1)

    x_spec = pl.BlockSpec((block_n, D), lambda i: (i, 0))
    w_spec = pl.BlockSpec((8, D), lambda i: (0, 0))
    b_spec = pl.BlockSpec(memory_space=pltpu.MemorySpace.SMEM)
    pred_spec = pl.BlockSpec((1, block_n), lambda i: (0, i))

    vmem_limit = _vmem_limit_bytes(block_n, D, itemsize, vmem_cap)
    cost = pl.CostEstimate(flops=2 * n_pad * D + 32 * n_pad,
                           transcendentals=n_pad,
                           bytes_accessed=int(n_pad * D * itemsize + 12 * n_pad))

    if fairness == "none":
        pred2d = pl.pallas_call(
            _lr_plain_kernel,
            out_shape=jax.ShapeDtypeStruct((1, n_pad), jnp.float32),
            grid_spec=pltpu.PrefetchScalarGridSpec(
                num_scalar_prefetch=0,
                grid=(nblk,),
                in_specs=[x_spec, w_spec, b_spec],
                out_specs=pred_spec),
            compiler_params=pltpu.CompilerParams(
                dimension_semantics=("parallel",),
                vmem_limit_bytes=vmem_limit),
            cost_estimate=cost,
        )(x_p, w_row, b_sm)
        return pred2d[0, :N].reshape(N, 1), None

    n_acc = 6 if fairness == "dp" else 12

    # Merge s and y into one (2, n_pad) lane-dense input (single DMA stream per step).
    sy = jnp.stack([jnp.ravel(jnp.asarray(s, jnp.float32)),
                    jnp.ravel(jnp.asarray(y, jnp.float32))], axis=0)
    if n_pad != N:
        sy = jnp.pad(sy, ((0, 0), (0, n_pad - N)))
    sy_spec = pl.BlockSpec((2, block_n), lambda i: (0, i))
    part_spec = pl.BlockSpec((_PART_ROWS, 128), lambda i: (i, 0))

    kernel = functools.partial(_lr_fair_kernel, fairness=fairness,
                               n_valid=N, block_n=block_n)
    pred2d, parts = pl.pallas_call(
        kernel,
        out_shape=(jax.ShapeDtypeStruct((1, n_pad), jnp.float32),
                   jax.ShapeDtypeStruct((nblk * _PART_ROWS, 128), jnp.float32)),
        grid_spec=pltpu.PrefetchScalarGridSpec(
            num_scalar_prefetch=0,
            grid=(nblk,),
            in_specs=[x_spec, w_spec, b_spec, sy_spec],
            out_specs=(pred_spec, part_spec)),
        compiler_params=pltpu.CompilerParams(
            dimension_semantics=("parallel",),   # no cross-step state -> megacore-shardable
            vmem_limit_bytes=vmem_limit),
        cost_estimate=cost,
    )(x_p, w_row, b_sm, sy)

    # Tiny epilogue (~50 flops) in plain JAX: reduce per-block partials, form mu, M @ mu - c.
    tot = jnp.sum(parts.reshape(nblk, _PART_ROWS, 128)[:, :n_acc, 0], axis=0)   # (n_acc,)

    def safe_div(num, den):
        return jnp.where(den == 0.0, 0.0, num / den)   # matches torch: empty group -> 0

    mu = jnp.stack([safe_div(tot[2 * k], tot[2 * k + 1]) for k in range(n_acc // 2)])
    M2 = jnp.asarray(M, jnp.float32)
    c2 = jnp.asarray(c, jnp.float32).reshape(-1)
    mmq = M2 @ mu - c2
    return pred2d[0, :N].reshape(N, 1), mmq


# ----------------------------------------------------------------------------
# Pure-JAX reference (for correctness check)
# ----------------------------------------------------------------------------
def lr_forward_ref(x, w, b, s, y, M, c, fairness):
    pred = jax.nn.sigmoid(x @ w + b[0, 0])
    if fairness == "none":
        return pred, None
    s = jnp.ravel(jnp.asarray(s, jnp.float32))
    y = jnp.ravel(jnp.asarray(y, jnp.float32))

    def mm(mask):
        m = mask.astype(jnp.float32)
        cnt = m.sum()
        return jnp.where(cnt == 0.0, 0.0, (pred[:, 0] * m).sum() / cnt)

    if fairness == "dp":
        mu = jnp.stack([mm(s == 0.0), mm(s == 1.0), pred.mean()])
    else:
        terms = []
        for u in (0.0, 1.0):
            for v in (0.0, 1.0):
                terms.append(mm((y == v) & (s == u)))
        for v in (0.0, 1.0):
            terms.append(mm(y == v))
        mu = jnp.stack(terms)
    return pred, M @ mu - c


# ----------------------------------------------------------------------------
if __name__ == "__main__":
    N, D = 300, 32         # batch (non-multiple of tile, exercises pad masking), input_size
    bound = 0.1            # eps

    key = jax.random.PRNGKey(0)
    kx, kw, kb, ks, ky = jax.random.split(key, 5)

    x = jax.random.normal(kx, (N, D), dtype=jnp.float32)
    limit = 1.0 / np.sqrt(D)
    w = jax.random.uniform(kw, (D, 1), minval=-limit, maxval=limit, dtype=jnp.float32)
    b = jax.random.uniform(kb, (1, 1), minval=-limit, maxval=limit, dtype=jnp.float32)
    s = jax.random.bernoulli(ks, 0.5, (N,)).astype(jnp.float32)
    y = jax.random.bernoulli(ky, 0.5, (N,)).astype(jnp.float32)

    ok = True
    for fairness in ("dp", "eo"):
        M_np, c_np = build_constraints(fairness, bound)
        M = jnp.asarray(M_np)
        c = jnp.asarray(c_np)
        pred_ref, mmq_ref = lr_forward_ref(x, w, b, s, y, M, c, fairness)

        # block_n=128 -> 3 grid steps (multi-block partials + pad masking); None -> auto tiling.
        for bn in (128, None):
            pred, mmq = lr_forward(x, w, b, s, y, M, c, fairness, block_n=bn)
            jax.block_until_ready((pred, mmq))
            ok &= bool(jnp.allclose(pred, pred_ref, atol=2e-5, rtol=2e-5))
            ok &= bool(jnp.allclose(mmq, mmq_ref, atol=1e-4, rtol=1e-4))

    # fairness == 'none' path (prediction only, m_mu_q is None as in PyTorch).
    pred_none, none_mmq = lr_forward(x, w, b, s, y, None, None, "none", block_n=128)
    jax.block_until_ready(pred_none)
    ok &= none_mmq is None
    ok &= bool(jnp.allclose(pred_none, jax.nn.sigmoid(x @ w + b[0, 0]),
                            atol=2e-5, rtol=2e-5))

    if not ok:
        raise AssertionError("Pallas kernel mismatch vs. reference")
    print("KERNEL_OK")
</pallas_src>

<mosaic_0001>
module attributes {stable_mosaic.version = 11 : i64} {
  func.func @_lr_fair_kernel(%arg0: i32, %arg1: memref<128x32xf32, #tpu.memory_space<vmem>>, %arg2: memref<8x32xf32, #tpu.memory_space<vmem>>, %arg3: memref<1x1xf32, #tpu.memory_space<smem>>, %arg4: memref<2x128xf32, #tpu.memory_space<vmem>>, %arg5: memref<1x128xf32, #tpu.memory_space<vmem>>, %arg6: memref<16x128xf32, #tpu.memory_space<vmem>>) attributes {dimension_semantics = [#tpu.dimension_semantics<parallel>], iteration_bounds = array<i64: 3>, scalar_prefetch = 0 : i64, scratch_operands = 0 : i64, tpu.core_type = #tpu.core_type<tc>, window_params = [{transform_indices = @transform_0, window_bounds = array<i64: 128, 32>}, {pipeline_mode = #tpu.pipeline_mode<synchronous>, transform_indices = @transform_1, window_bounds = array<i64: 8, 32>}, {transform_indices = @transform_2, window_bounds = array<i64: 1, 1>}, {transform_indices = @transform_3, window_bounds = array<i64: 2, 128>}, {transform_indices = @transform_4, window_bounds = array<i64: 1, 128>}, {transform_indices = @transform_5, window_bounds = array<i64: 16, 128>}]} {
    %c0 = arith.constant 0 : index
    %c0_0 = arith.constant 0 : index
    %0 = vector.load %arg2[%c0, %c0_0] : memref<8x32xf32, #tpu.memory_space<vmem>>, vector<8x32xf32>
    %c0_1 = arith.constant 0 : index
    %c0_2 = arith.constant 0 : index
    %1 = vector.load %arg1[%c0_1, %c0_2] : memref<128x32xf32, #tpu.memory_space<vmem>>, vector<128x32xf32>
    %cst = arith.constant dense<0.000000e+00> : vector<8x128xf32>
    %2 = tpu.matmul %0, %1, %cst {dimension_numbers = #tpu.dot_dimension_numbers<[1], [1], [0], [0], [0, 0, 1, 0], [], []>} : vector<8x32xf32>, vector<128x32xf32>, vector<8x128xf32> -> vector<8x128xf32>
    %3 = vector.extract_strided_slice %2 {offsets = [0, 0], sizes = [1, 128], strides = [1, 1]} : vector<8x128xf32> to vector<1x128xf32>
    %c0_3 = arith.constant 0 : index
    %c0_4 = arith.constant 0 : index
    %4 = memref.load %arg3[%c0_3, %c0_4] : memref<1x1xf32, #tpu.memory_space<smem>>
    %5 = vector.broadcast %4 : f32 to vector<1x128xf32>
    %6 = arith.addf %3, %5 : vector<1x128xf32>
    %7 = arith.negf %6 : vector<1x128xf32>
    %8 = math.exp %7 : vector<1x128xf32>
    %cst_5 = arith.constant 1.000000e+00 : f32
    %9 = vector.broadcast %cst_5 : f32 to vector<1x128xf32>
    %10 = arith.addf %9, %8 : vector<1x128xf32>
    %11 = arith.divf %9, %10 : vector<1x128xf32>
    %c0_6 = arith.constant 0 : index
    %c0_7 = arith.constant 0 : index
    %12 = vector.load %arg5[%c0_6, %c0_7] : memref<1x128xf32, #tpu.memory_space<vmem>>, vector<1x128xf32>
    tpu.vector_store %arg5[%c0_6, %c0_7], %11 {strides = array<i32>} : memref<1x128xf32, #tpu.memory_space<vmem>>, vector<1x128xf32>,
    %13 = tpu.iota {dimensions = array<i32: 1>} : vector<1x128xi32>
    %c128_i32 = arith.constant 128 : i32
    %14 = arith.muli %arg0, %c128_i32 : i32
    %15 = vector.broadcast %14 : i32 to vector<1x128xi32>
    %16 = arith.addi %15, %13 : vector<1x128xi32>
    %c300_i32 = arith.constant 300 : i32
    %17 = vector.broadcast %c300_i32 : i32 to vector<1x128xi32>
    %18 = arith.cmpi slt, %16, %17 : vector<1x128xi32>
    %19 = arith.extui %18 : vector<1x128xi1> to vector<1x128xi32>
    %20 = arith.sitofp %19 : vector<1x128xi32> to vector<1x128xf32>
    %c0_8 = arith.constant 0 : index
    %c0_9 = arith.constant 0 : index
    %21 = vector.load %arg4[%c0_8, %c0_9] : memref<2x128xf32, #tpu.memory_space<vmem>>, vector<1x128xf32>
    %cst_10 = arith.constant 0.000000e+00 : f32
    %22 = vector.broadcast %cst_10 : f32 to vector<1x128xf32>
    %23 = arith.cmpf oeq, %21, %22 : vector<1x128xf32>
    %cst_11 = arith.constant 1.000000e+00 : f32
    %cst_12 = arith.constant 0.000000e+00 : f32
    %24 = vector.broadcast %cst_11 : f32 to vector<1x128xf32>
    %25 = vector.broadcast %cst_12 : f32 to vector<1x128xf32>
    %26 = arith.select %23, %24, %25 : vector<1x128xi1>, vector<1x128xf32>
    %27 = arith.mulf %26, %20 : vector<1x128xf32>
    %cst_13 = arith.constant 1.000000e+00 : f32
    %28 = vector.broadcast %cst_13 : f32 to vector<1x128xf32>
    %29 = arith.cmpf oeq, %21, %28 : vector<1x128xf32>
    %cst_14 = arith.constant 1.000000e+00 : f32
    %cst_15 = arith.constant 0.000000e+00 : f32
    %30 = vector.broadcast %cst_14 : f32 to vector<1x128xf32>
    %31 = vector.broadcast %cst_15 : f32 to vector<1x128xf32>
    %32 = arith.select %29, %30, %31 : vector<1x128xi1>, vector<1x128xf32>
    %33 = arith.mulf %32, %20 : vector<1x128xf32>
    %34 = arith.mulf %11, %27 : vector<1x128xf32>
    %35 = arith.mulf %11, %33 : vector<1x128xf32>
    %36 = arith.mulf %11, %20 : vector<1x128xf32>
    %cst_16 = arith.constant dense<0.000000e+00> : vector<1xf32>
    %37 = vector.multi_reduction <add>, %34, %cst_16 [1] : vector<1x128xf32> to vector<1xf32>
    %38 = vector.shape_cast %37 : vector<1xf32> to vector<1x1xf32>
    %cst_17 = arith.constant dense<0.000000e+00> : vector<1xf32>
    %39 = vector.multi_reduction <add>, %27, %cst_17 [1] : vector<1x128xf32> to vector<1xf32>
    %40 = vector.shape_cast %39 : vector<1xf32> to vector<1x1xf32>
    %cst_18 = arith.constant dense<0.000000e+00> : vector<1xf32>
    %41 = vector.multi_reduction <add>, %35, %cst_18 [1] : vector<1x128xf32> to vector<1xf32>
    %42 = vector.shape_cast %41 : vector<1xf32> to vector<1x1xf32>
    %cst_19 = arith.constant dense<0.000000e+00> : vector<1xf32>
    %43 = vector.multi_reduction <add>, %33, %cst_19 [1] : vector<1x128xf32> to vector<1xf32>
    %44 = vector.shape_cast %43 : vector<1xf32> to vector<1x1xf32>
    %cst_20 = arith.constant dense<0.000000e+00> : vector<1xf32>
    %45 = vector.multi_reduction <add>, %36, %cst_20 [1] : vector<1x128xf32> to vector<1xf32>
    %46 = vector.shape_cast %45 : vector<1xf32> to vector<1x1xf32>
    %cst_21 = arith.constant dense<0.000000e+00> : vector<1xf32>
    %47 = vector.multi_reduction <add>, %20, %cst_21 [1] : vector<1x128xf32> to vector<1xf32>
    %48 = vector.shape_cast %47 : vector<1xf32> to vector<1x1xf32>
    %49 = tpu.concatenate %38, %40, %42, %44, %46, %48 in 0 : vector<1x1xf32>, vector<1x1xf32>, vector<1x1xf32>, vector<1x1xf32>, vector<1x1xf32>, vector<1x1xf32> -> vector<6x1xf32>
    %cst_22 = arith.constant 0.000000e+00 : f32
    %50 = vector.broadcast %cst_22 : f32 to vector<16x128xf32>
    %c0_23 = arith.constant 0 : index
    %c0_24 = arith.constant 0 : index
    %51 = vector.load %arg6[%c0_23, %c0_24] : memref<16x128xf32, #tpu.memory_space<vmem>>, vector<16x128xf32>
    tpu.vector_store %arg6[%c0_23, %c0_24], %50 {strides = array<i32>} : memref<16x128xf32, #tpu.memory_space<vmem>>, vector<16x128xf32>,
    %c0_25 = arith.constant 0 : index
    %c0_26 = arith.constant 0 : index
    %52 = vector.load %arg6[%c0_25, %c0_26] : memref<16x128xf32, #tpu.memory_space<vmem>>, vector<6x1xf32>
    tpu.vector_store %arg6[%c0_25, %c0_26], %49 {strides = array<i32>} : memref<16x128xf32, #tpu.memory_space<vmem>>, vector<6x1xf32>,
    return
  }
  func.func @transform_0(%arg0: i32) -> (i32, i32) {
    %c0_i32 = arith.constant 0 : i32
    %c0_i32_0 = arith.constant 0 : i32
    return %arg0, %c0_i32 : i32, i32
  }
  func.func @transform_1(%arg0: i32) -> (i32, i32) {
    %c0_i32 = arith.constant 0 : i32
    %c0_i32_0 = arith.constant 0 : i32
    %c0_i32_1 = arith.constant 0 : i32
    return %c0_i32, %c0_i32_0 : i32, i32
  }
  func.func @transform_2(%arg0: i32) -> (i32, i32) {
    %c0_i32 = arith.constant 0 : i32
    %c0_i32_0 = arith.constant 0 : i32
    %c0_i32_1 = arith.constant 0 : i32
    return %c0_i32, %c0_i32_0 : i32, i32
  }
  func.func @transform_3(%arg0: i32) -> (i32, i32) {
    %c0_i32 = arith.constant 0 : i32
    %c0_i32_0 = arith.constant 0 : i32
    return %c0_i32, %arg0 : i32, i32
  }
  func.func @transform_4(%arg0: i32) -> (i32, i32) {
    %c0_i32 = arith.constant 0 : i32
    %c0_i32_0 = arith.constant 0 : i32
    return %c0_i32, %arg0 : i32, i32
  }
  func.func @transform_5(%arg0: i32) -> (i32, i32) {
    %c0_i32 = arith.constant 0 : i32
    %c0_i32_0 = arith.constant 0 : i32
    return %arg0, %c0_i32 : i32, i32
  }
}

</mosaic_0001>

<bundles_post_ra>
// kernel: tpu_custom_call.1
= control target key start
LH: loop header
LB: loop body
LE: loop exit
PB: predicated region body
PF: predicated region fallthrough
CT: control target
= control target key end

     0   :  { %s952_s0 = inlined_call_operand.vmem [shape: f32[384,32], index: 0, kind: input, shape index: {}]   ;;  %s953_s1 = inlined_call_operand.vmem [shape: f32[8,32], index: 1, kind: input, shape index: {}]   ;;  %s954_s2 = inlined_call_operand.<no memory space> [shape: f32[1,1], index: 2, kind: input, shape index: {}]   ;;  %s955_s3 = inlined_call_operand.vmem [shape: f32[2,384], index: 3, kind: input, shape index: {}]   ;;  %s956_s4 = inlined_call_operand.hbm [shape: f32[1,384], index: 4, kind: output, shape index: {0}]   ;;  %s957_s5 = inlined_call_operand.hbm [shape: f32[48,128], index: 5, kind: output, shape index: {1}]  }
   0x1   :  { %11 = sst [smem:[#allocation2]] %s954_s2 }
   0x2   :  { %12 = vsyncpa [#allocation4], 0 }
   0x3   :  { %14 = vsyncpa [#allocation4 + $0x1], 0 }
   0x4   :  { %15 = vsyncpa [#allocation6], 0 }
   0x5   :  { %17 = vsyncpa [#allocation6 + $0x1], 0  ;;  %s779_s20 = smov 0   ;;  %s781_s21 = smov 0  }
   0x6   :  { %s783_s22 = smov 0   ;;  %s785_s23 = smov 0  }
   0x7 LB: > { %s800_s2 = sadd.s32 4294967295, %s741_s23   ;;  %s562_s24 = sadd.s32 4294967294, %s741_s23   ;;  %s741_s23 = sphi %s785_s23, %s963_s23   ;;  %s737_s22 = sphi %s783_s22, %s962_s22   ;;  %s733_s21 = sphi %s781_s21, %s961_s21   ;;  %s729_s20 = sphi %s779_s20, %s960_s20  }
   0x8   : > { %s804_s25 = sadd.s32 1, %s741_s23   ;;  %s124_s26 = sadd.s32 1, %s737_s22 }
   0x9   : > { %s121_s27 = ssub.s32 %s741_s23, %s804_s25  ;;  %p134_p0 = scmp.ne.s32.totalorder %s737_s22, %s733_s21 }
   0xa   : > { %p122_p1 = scmp.eq.s32.totalorder %s121_s27, 0  ;;  %p135_p2 = scmp.eq.s32.totalorder %s800_s2, 2 }
   0xb   : > { %p140_p3 = scmp.ne.s32.totalorder %s733_s21, %s729_s20  ;;  %p141_p4 = scmp.eq.s32.totalorder %s562_s24, 2 }
   0xc   : > { %s815_s28 = scalar_select %p122_p1, %s737_s22, %s124_s26  }
   0xd   : > { %p817_p5 = por %p135_p2, %p134_p0  ;;  %p821_p6 = por %p141_p4, %p140_p3 }
   0xe   : > { %p565_p7 = scmp.ge.s32.totalorder %s741_s23, 1  ;;  %p207_p8 = scmp.lt.s32.totalorder %s741_s23, 4 }
  0x10   : > { %p208_p9 = pnand %p565_p7, %p207_p8 }
  0x11   : > { %s828_s6 = sshll.u32 (!%p208_p9), %s800_s2, 4  ;;  %p249_p11 = scmp.lt.s32.totalorder (!%p208_p9), %s800_s2, 2 }
  0x12   : > { %211 = sbr.rel (%p208_p9) target bundleno = 384 (0x180), region = 36  ;;  %p244_p10 = scmp.lt.s32.totalorder (!%p208_p9), %s828_s6, 47 }
  0x13   : > { %s588_s16 = sshll.u32 (!%p208_p9), %s800_s2, 7  ;;  %s343_s24 = sld [smem:[#allocation2]] (!%p208_p9) }
  0x14   : > { %s884_s26 = sand.u32 (!%p208_p9), 1, %s733_s21   ;;  %s441_s10 = scalar_lea.hbm (!%p208_p9), %s956_s4, %s800_s2 }
  0x15   : > { %s235_s27 = scalar_lea.vmem (!%p208_p9), [#allocation3], %s884_s26  ;;  %s445_s13 = sshll.u32 (!%p208_p9), %s441_s10, 4  ;;  %s446_s13 = int_to_ptr.hbm [resolvable:$true] %s445_s13 }
  0x16   : > { %s443_s12 = sshll.u32 (!%p208_p9), %s235_s27, 4  ;;  %s667_s18 = scalar_lea.hbm (!%p208_p9), %s956_s4, 3  ;;  %s444_s12 = int_to_ptr.vmem [resolvable:$true] %s443_s12 }
  0x17   : > { %s245_s7 = scalar_select %p244_p10, %s828_s6, 47  ;;  %vm271_vm0 = vcmask 261120   ;;  %v254_v16 = vld [vmem:[%s953_s1] sm:$0xff]  ;;  %v366_v17 = vlaneseq  ;;  %v369_v19 = vstv %s588_s16  ;;  %v743_v22 = vmov 0.0  }
  0x18   : > { %s250_s14 = scalar_select %p249_p11, %s800_s2, 2  ;;  %vm384_vm3 = vcmask 1040384  }
  0x19   : > { %s568_s8 = sshll.u32 %s245_s7, 3  ;;  %v367_v18 = vand.u32 127, %v366_v17  ;;  %v344_v27 = vstv %s343_s24  ;;  %s566_s7 = sshll.u32 %s884_s26, 4 }
  0x1a   : > { %s835_s11 = scalar_lea.vmem %s952_s0, %s568_s8  ;;  %s569_s15 = sshll.u32 %s250_s14, 1 }
  0x1b   : > { %v270_v0 = vld [vmem:[%s835_s11 + $0x78] sm:$0xff]  ;;  %v269_v1 = vld [vmem:[%s835_s11 + $0x70] sm:$0xff]  ;;  %v268_v2 = vld [vmem:[%s835_s11 + $0x68] sm:$0xff]  ;;  %s252_s19 = scalar_lea.vmem %s955_s3, %s569_s15  ;;  %v370_v20 = vadd.s32 %v369_v19, %v367_v18  ;;  %s428_s14 = scalar_lea.sflag [#allocation4], %s884_s26 }
  0x1c   : > { %570 = vmatpush.xpose.msk.msra.mxu0 %vm271_vm0, %v270_v0  ;;  %v267_v3 = vld [vmem:[%s835_s11 + $0x60] sm:$0xff]  ;;  %v266_v4 = vld [vmem:[%s835_s11 + $0x58] sm:$0xff]  ;;  %v265_v5 = vld [vmem:[%s835_s11 + $0x50] sm:$0xff]  ;;  %s661_s15 = sshra.s32 %s446_s13, 4  ;;  %s662_s15 = int_to_ptr.hbm [resolvable:$true] %s661_s15 }
  0x1d   : > { %v264_v6 = vld [vmem:[%s835_s11 + $0x48] sm:$0xff]  ;;  %v263_v7 = vld [vmem:[%s835_s11 + $0x40] sm:$0xff]  ;;  %v262_v8 = vld [vmem:[%s835_s11 + $0x38] sm:$0xff]  ;;  %vm371_vm1 = vcmp.lt.s32.totalorder %v370_v20, 300  ;;  %s663_s16 = scalar_lea.hbm %s662_s15, 1  ;;  %p668_p1 = scmp.lt.s32.totalorder %s662_s15, %s956_s4 }
  0x1e   : > { %v261_v9 = vld [vmem:[%s835_s11 + $0x30] sm:$0xff]  ;;  %v260_v10 = vld [vmem:[%s835_s11 + $0x28] sm:$0xff]  ;;  %v259_v11 = vld [vmem:[%s835_s11 + $0x20] sm:$0xff]  ;;  %v879_v23 = vsel %vm371_vm1, 1.0, %v743_v22  ;;  %p664_p12 = scmp.ne.s32.totalorder %s662_s15, %s663_s16  ;;  %p669_p2 = scmp.lt.s32.totalorder %s667_s18, %s663_s16 }
  0x1f   : > { %v258_v12 = vld [vmem:[%s835_s11 + $0x18] sm:$0xff]  ;;  %v257_v13 = vld [vmem:[%s835_s11 + $0x10] sm:$0xff]  ;;  %v256_v14 = vld [vmem:[%s835_s11 + $0x8] sm:$0xff] }
  0x20   : > { %571 = vmatpush.xpose.msk.msra.mxu0 %vm271_vm0, %v269_v1  ;;  %v255_v15 = vld [vmem:[%s835_s11] sm:$0xff]  ;;  %s897_s11 = scalar_lea.vmem [#allocation5], %s566_s7  ;;  %p665_p13 = pnand %p664_p12, %p817_p5 }
  0x21   : > { %v374_v21 = vld [vmem:[%s252_s19] sm:$0x1]  ;;  %423 = vst [vmem:[%s897_s11] sm:$0xff] %v743_v22  ;;  %p670_p3 = por %p669_p2, %p668_p1 }
  0x22   : > { %vm375_vm2 = vcmp.eq.f32.partialorder %v374_v21, 0.0  ;;  %vm378_vm4 = vcmp.eq.f32.partialorder %v374_v21, 1.0  ;;  %424 = vst [vmem:[%s897_s11 + $0x8] sm:$0xff] %v743_v22  ;;  %p666_p0 = pneg %p665_p13 }
  0x23   : > { %v376_v24 = vsel %vm375_vm2, 1.0, %v743_v22  ;;  %v379_v37 = vsel %vm378_vm4, 1.0, %v743_v22 }
  0x24   : > { %572 = vmatpush.xpose.msk.msra.mxu0 %vm271_vm0, %v268_v2  ;;  %v377_v25 = vmul.f32 %v879_v23, %v376_v24  ;;  %v380_v41 = vmul.f32 %v879_v23, %v379_v37  ;;  %p671_p4 = pnand %p670_p3, %p666_p0 }
  0x26   : > { %v388_v26 = vsel %vm384_vm3, %v377_v25, 0.0 }
  0x27   : > { %389 = vadd.xlane.f32.xlu0 %v388_v26 }
  0x28   : > { %573 = vmatpush.xpose.msk.msra.mxu0 %vm271_vm0, %v267_v3 }
  0x2c   : > { %574 = vmatpush.xpose.msk.msra.mxu0 %vm271_vm0, %v266_v4 }
  0x30   : > { %575 = vmatpush.xpose.msk.msra.mxu0 %vm271_vm0, %v265_v5 }
  0x34   : > { %576 = vmatpush.xpose.msk.msra.mxu0 %vm271_vm0, %v264_v6 }
  0x38   : > { %577 = vmatpush.xpose.msk.msra.mxu0 %vm271_vm0, %v263_v7 }
  0x3c   : > { %578 = vmatpush.xpose.msk.msra.mxu0 %vm271_vm0, %v262_v8 }
  0x40   : > { %579 = vmatpush.xpose.msk.msra.mxu0 %vm271_vm0, %v261_v9 }
  0x44   : > { %580 = vmatpush.xpose.msk.msra.mxu0 %vm271_vm0, %v260_v10 }
  0x48   : > { %581 = vmatpush.xpose.msk.msra.mxu0 %vm271_vm0, %v259_v11 }
  0x4c   : > { %582 = vmatpush.xpose.msk.msra.mxu0 %vm271_vm0, %v258_v12 }
  0x50   : > { %583 = vmatpush.xpose.msk.msra.mxu0 %vm271_vm0, %v257_v13 }
  0x54   : > { %584 = vmatpush.xpose.msk.msra.mxu0 %vm271_vm0, %v256_v14 }
  0x58   : > { %585 = vmatpush.xpose.msk.msra.mxu0 %vm271_vm0, %v255_v15 }
  0x5b   : > { %586 = vmatmul.msk.f32.vlgmr.msra.gmra.mxu0 %vm271_vm0, %v254_v16 }
  0xd8   : > { %v340_v28 = vpop.f32.mrf.mxu0 }
  0xd9   : > { %v345_v29 = vadd.f32 %v344_v27, %v340_v28 }
  0xdb   : > { %v587_v30 = vmul.f32 -1.442695, %v345_v29 }
  0xdd   : > { %643 = vpow2.f32 %v587_v30 }
  0xe3   : > { %v644_v31 = vpop.eup %643 }
  0xe4   : > { %v349_v32 = vadd.f32 1.0, %v644_v31 }
  0xe6   : > { %645 = vrcp.f32 %v349_v32  ;;  %v361_v36 = vand.u32 2147483648, %v349_v32  ;;  %v359_v39 = vand.u32 2147483647, %v349_v32  ;;  %vm355_vm6 = vweird.f32 %v349_v32 }
  0xe8   : > { %v362_v42 = vor.u32 1.1754944e-38, %v361_v36  ;;  %vm360_vm8 = vcmp.eq.f32.partialorder %v359_v39, 8.507059e+37 }
  0xec   : > { %v646_v33 = vpop.eup %645 }
  0xed   : > { %v351_v34 = vmul.f32 %v646_v33, %v349_v32  ;;  %vm356_vm5 = vweird.f32 %v646_v33 }
  0xee   : > { %vm357_vm7 = vmor %vm355_vm6, %vm356_vm5 }
  0xef   : > { %v352_v35 = vsub.f32 1.0, %v351_v34 }
  0xf1   : > { %v353_v38 = vmul.f32 %v646_v33, %v352_v35 }
  0xf3   : > { %v354_v40 = vadd.f32 %v646_v33, %v353_v38 }
  0xf5   : > { %v358_v43 = vsel %vm357_vm7, %v646_v33, %v354_v40 }
  0xf6   : > { %v363_v44 = vsel %vm360_vm8, %v362_v42, %v358_v43 }
  0xf7   : > { %v383_v45 = vmul.f32 %v879_v23, %v363_v44  ;;  %v382_v46 = vmul.f32 %v380_v41, %v363_v44  ;;  %v381_v47 = vmul.f32 %v377_v25, %v363_v44  ;;  %365 = vst [vmem:[%s235_s27] sm:$0x1] %v363_v44 }
  0xf9   : > { %v397_v48 = vsel %vm384_vm3, %v383_v45, 0.0  ;;  %v391_v49 = vsel %vm384_vm3, %v382_v46, 0.0  ;;  %v385_v50 = vsel %vm384_vm3, %v381_v47, 0.0 }
  0xfa   : > { %398 = vadd.xlane.f32.xlu2 %v397_v48  ;;  %392 = vadd.xlane.f32.xlu0 %v391_v49 }
  0xfb   : > { %386 = vadd.xlane.f32.xlu1 %v385_v50 }
  0xfc   : > { %674 = shalt.err (!%p671_p4)
}
  0xfd   : > { %596 = dma.vmem_to_hbm [thread:$0]  (%p817_p5), %s444_s12, 16, %s446_s13, %s428_s14   ;;  %v394_v51 = vsel %vm384_vm3, %v380_v41, 0.0  ;;  %v390_v52 = vpop.xlane.xlu0 %389  ;;  %vm415_vm9 = vcmask 1041408   ;;  %vm417_vm10 = vcmask 1042432   ;;  %vm419_vm11 = vcmask 1043456  }
  0xfe   : > { %v403_v55 = vrot.slane %v390_v52, 7  ;;  %s456_s8 = scalar_lea.hbm %s957_s5, %s828_s6  ;;  %s457_s9 = sshll.u32 %s897_s11, 4  ;;  %vm421_vm12 = vcmask 1044480   ;;  %vm425_vm13 = vcmask 5120   ;;  %s458_s9 = int_to_ptr.vmem [resolvable:$true] %s457_s9 }
  0xff   : > { %s920_s10 = sshll.u32 %s456_s8, 4  ;;  %s432_s6 = scalar_lea.sflag [#allocation6], %s884_s26  ;;  %s460_s10 = int_to_ptr.hbm [resolvable:$true] %s920_s10 }
 0x100   : > { %s689_s12 = sshra.s32 %s460_s10, 4  ;;  %s695_s16 = scalar_lea.hbm %s957_s5, 48  ;;  %s690_s12 = int_to_ptr.hbm [resolvable:$true] %s689_s12 }
 0x101   : > { %s691_s13 = scalar_lea.hbm %s690_s12, 16  ;;  %p696_p10 = scmp.lt.s32.totalorder %s690_s12, %s957_s5 }
 0x102   : > { %400 = vadd.xlane.f32.xlu2 %v879_v23  ;;  %p692_p7 = scmp.ne.s32.totalorder %s690_s12, %s691_s13  ;;  %p697_p11 = scmp.lt.s32.totalorder %s695_s16, %s691_s13 }
 0x103   : > { %395 = vadd.xlane.f32.xlu1 %v394_v51 }
 0x104   : > { %p693_p8 = pnand %p692_p7, %p817_p5  ;;  %p698_p12 = por %p697_p11, %p696_p10 }
 0x106   : > { %p694_p9 = pneg %p693_p8 }
 0x108   : > { %p699_p13 = pnand %p698_p12, %p694_p9 }
 0x16d   : > { %v399_v54 = vpop.xlane.xlu2 %398  ;;  %v393_v56 = vpop.xlane.xlu0 %392 }
 0x16e   : > { %v387_v53 = vpop.xlane.xlu1 %386  ;;  %v406_v57 = vrot.slane %v393_v56, 6  ;;  %v412_v61 = vrot.slane %v399_v54, 4 }
 0x16f   : > { %v414_v58 = vsel %vm384_vm3, %v387_v53, %v403_v55 }
 0x170   : > { %v416_v62 = vsel %vm415_vm9, %v414_v58, %v406_v57 }
 0x175   : > { %v401_v63 = vpop.xlane.xlu2 %400 }
 0x176   : > { %v396_v59 = vpop.xlane.xlu1 %395 }
 0x177   : > { %v409_v60 = vrot.slane %v396_v59, 5 }
 0x179   : > { %v418_v0 = vsel %vm417_vm10, %v416_v62, %v409_v60 }
 0x17a   : > { %v420_v1 = vsel %vm419_vm11, %v418_v0, %v412_v61 }
 0x17b   : > { %v422_v2 = vsel %vm421_vm12, %v420_v1, %v401_v63 }
 0x17c   : > { %426 = vst.msk [vmem:[%s897_s11] sm:$0x3f] %vm425_vm13, %v422_v2 }
 0x17d   : > { %702 = shalt.err (!%p699_p13)
}
 0x17e   : > { %s744_s26 = smov 128   ;;  %s745_s11 = smov 8  }
 0x17f   : > { %597 = dma.vmem_to_hbm [thread:$0]  (%p817_p5), %s458_s9, 256, %s460_s10, %s432_s6, %s744_s26, %s744_s26, %s745_s11  }
 0x180 PF: > { %p607_p0 = scmp.ge.s32.totalorder %s741_s23, 2  ;;  %s474_s18 = sand.u32 1, %s729_s20  }
 0x181   : > { %s475_s19 = scalar_lea.sflag [#allocation4], %s474_s18 }
 0x182   : > { %p601_p1 = pnand %p607_p0, %p821_p6 }
 0x184   : > { %p602_p2 = pneg %p601_p1 }
 0x186   : > { %720 = dma.done.wait (%p602_p2), %s475_s19, 16  }
 0x187   : > { %722 = vsyncadd (%p602_p2), %s475_s19, 4294967280  ;;  %s484_s24 = scalar_lea.sflag [#allocation6], %s474_s18 }
 0x188   : > { %724 = dma.done.wait (%p602_p2), %s484_s24, 256  }
 0x189   : > { %726 = vsyncadd (%p602_p2), %s484_s24, 4294967040  ;;  %p20_p5 = scmp.ge.s32.totalorder %s804_s25, 5   ;;  %s960_s20 = smov %s733_s21 }
 0x18a   : > { %s961_s21 = smov %s737_s22  ;;  %s962_s22 = smov %s815_s28 }
 0x18b   : > { %s963_s23 = smov %s804_s25  ;;  %22 = sbr.rel (!%p20_p5) target bundleno = 7 (0x7), region = 91 }
 0x190   :  { %490 = vsyncpa [#allocation4], 1 }
 0x191   :  { %492 = vsyncpa [#allocation4 + $0x1], 1 }
 0x192   :  { %493 = vsyncpa [#allocation6], 1 }
 0x193   :  { %495 = vsyncpa [#allocation6 + $0x1], 1 }

</bundles_post_ra>
